<compile_context>
chip_gen: v7x
topology: tpu7x:2x2x1
jax: 0.10.0
libtpu: 0.0.40
codegen_flags: <defaults>
</compile_context>

<pallas_src>
import functools

import numpy as np
import jax
import jax.numpy as jnp
from jax.experimental import pallas as pl
from jax.experimental.pallas import tpu as pltpu


# ----------------------------------------------------------------------------
# Operator setup (deterministic host-side glue, no file loads)
# ----------------------------------------------------------------------------
def gaussian_kernel_1d(radius: int, sigma: float) -> np.ndarray:
    """1-D factor of the wnet gaussian_kernel: exp(-d^2 / (2 sigma^2)), center == 1."""
    x = np.arange(-radius, radius + 1, dtype=np.float64)
    return np.exp(-(x * x) / (2.0 * sigma * sigma))


def build_conv_matrix_1d(n: int, radius: int, sigma: float) -> np.ndarray:
    """Symmetric matrix A with A[p, i] = k1[p - i + r] for |p-i| <= r else 0, so that
    A_H @ x @ A_W == F.conv2d(x, outer(k1,k1), padding=r) (zero padding)."""
    k1 = gaussian_kernel_1d(radius, sigma)
    d = np.arange(n)[:, None] - np.arange(n)[None, :]
    a = np.where(np.abs(d) <= radius, k1[np.clip(d + radius, 0, 2 * radius)], 0.0)
    return a.astype(np.float32)


# ----------------------------------------------------------------------------
# Shared in-kernel helpers
# ----------------------------------------------------------------------------
def _sum_spatial(x, keep: int = 1):
    """Sum over all trailing spatial dims (one axis at a time), keeping `keep` leading dims."""
    while x.ndim > keep:
        x = jnp.sum(x, axis=-1)
    return x


def _pixel_weights(cp, x, inv_hw, inv_s2_sq):
    """weights = exp(-(sum_c (x_c - m_c)^2)^2 / sigma_2^2) with m = per-(n,c) class mean.

    Uses the algebraic form  diff = sum_c x_c^2 - 2*sum_c x_c*m_c + sum_c m_c^2
    (per review): ~2 VPU passes per channel instead of ~4-5.  The class-mean reductions
    stay on the VPU/XLU: per grid step they are degenerate (1 x HW) contractions and are
    negligible next to the conv matmuls.
      cp: (N, *S) class probabilities,  x: (N, C, *S) raw images  ->  (N, *S) weights.
    """
    n = cp.shape[0]
    num_ch = x.shape[1]
    expand = (slice(None),) + (None,) * (cp.ndim - 1)          # (N,) -> (N, 1, ...)
    den = _sum_spatial(cp) * inv_hw + 1e-5                     # (N,)
    sum_sq = jnp.zeros(cp.shape, jnp.float32)
    cross = jnp.zeros(cp.shape, jnp.float32)
    msq = jnp.zeros((n,), jnp.float32)
    for ci in range(num_ch):                                   # C is tiny & static -> unrolled
        xc = x[:, ci]                                          # (N, *S)
        mc = (_sum_spatial(cp * xc) * inv_hw) / den            # (N,)  class mean, channel ci
        sum_sq = sum_sq + xc * xc
        cross = cross + xc * mc[expand]
        msq = msq + mc * mc
    diff = sum_sq - 2.0 * cross + msq[expand]                  # sum_c (x_c - m_c)^2
    return jnp.exp(-(diff * diff) * inv_s2_sq)


def _finalize(cp, conv_cp, weights, out_ref):
    """Fused final reductions: conv_cp / weights / cp are each read exactly once."""
    cw = conv_cp * weights
    numer = jnp.sum(cw * cp)           # == sum(cp * conv(cp*w))   (symmetric operator)
    denom = jnp.sum(cw)                # == sum(cp * conv(w))
    ratio = jnp.abs(numer / (denom + 1e-6))
    out_ref[...] = jnp.full(out_ref.shape, ratio, dtype=jnp.float32)


# ----------------------------------------------------------------------------
# Pallas kernels (one grid step == one class)
# ----------------------------------------------------------------------------
def _ncut_dense_kernel(cp_ref, x_ref, g_ref, out_ref, *, sigma_2):
    """Small-image path: lane-flat (N, HW) layout + dense kron Gaussian operator."""
    cp = cp_ref[0]                                             # (N, HW) f32
    x = x_ref[...]                                             # (N, C, HW) f32
    hw = cp.shape[-1]
    weights = _pixel_weights(cp, x, 1.0 / float(hw), 1.0 / (sigma_2 * sigma_2))

    # conv(cp) with the dense symmetric operator G = kron(A_H, A_W): ONE lane-dense
    # (N, HW) @ (HW, HW) bf16 matmul with f32 accumulation (HW-deep contraction).
    conv_cp = jnp.dot(cp.astype(jnp.bfloat16), g_ref[...],
                      preferred_element_type=jnp.float32)      # (N, HW) f32
    _finalize(cp, conv_cp, weights, out_ref)


def _ncut_sep_kernel(cp_ref, x_ref, ah_ref, aw_ref, out_ref, *, sigma_2):
    """Large-image path: exact separable factorization conv = A_H @ cp @ A_W."""
    cp = cp_ref[0]                                             # (N, H, W) f32
    x = x_ref[...]                                             # (N, C, H, W) f32
    n, h, w = cp.shape
    weights = _pixel_weights(cp, x, 1.0 / float(h * w), 1.0 / (sigma_2 * sigma_2))

    # Column conv: one (N*H, W) @ (W, W) matmul, popped directly to bf16 (f32 MXU
    # accumulation internally; no separate cast pass, half the VMEM for t1).
    t1 = jnp.dot(cp.reshape(n * h, w).astype(jnp.bfloat16), aw_ref[...],
                 preferred_element_type=jnp.bfloat16).reshape(n, h, w)
    # Row conv: N full-size (H, H) @ (H, W) matmuls (N static & tiny).  No broadcast_to
    # of A_H, no per-(class,batch) under-filled batched einsum, no 16-bit transposes;
    # the final reductions are fused into the same loop so conv is never materialized
    # as a full (N, H, W) temporary.
    ah = ah_ref[...]                                           # (H, H) bf16
    numer = jnp.float32(0.0)
    denom = jnp.float32(0.0)
    for ni in range(n):
        conv_n = jnp.dot(ah, t1[ni], preferred_element_type=jnp.float32)   # (H, W) f32
        cw = conv_n * weights[ni]
        numer = numer + jnp.sum(cw * cp[ni])
        denom = denom + jnp.sum(cw)
    ratio = jnp.abs(numer / (denom + 1e-6))
    out_ref[...] = jnp.full(out_ref.shape, ratio, dtype=jnp.float32)


# ----------------------------------------------------------------------------
# Wrapper
# ----------------------------------------------------------------------------
def ncut_loss_pallas(labels_nkhw, inputs_nchw, *, radius: int = 4, sigma_1: float = 5.0,
                     sigma_2: float = 1.0, force_separable: bool = False,
                     dense_hw_max: int = 4096):
    """Continuous N-Cut loss; labels (N, K, H, W) class probs, inputs (N, C, H, W) images."""
    n, k, h, w = labels_nkhw.shape
    c = inputs_nchw.shape[1]
    hw = h * w
    use_dense = (hw <= dense_hw_max) and not force_separable

    # VMEM limit: ~75% of the physical per-core capacity (48 MiB on v7x, 96 MiB on
    # v5e/v6e), never the hard-coded 64 MiB that equals v7x's entire VMEM.
    try:
        vmem_cap = int(pltpu.get_tpu_info().vmem_capacity_bytes)
    except Exception:
        vmem_cap = 64 * 1024 * 1024
    vmem_limit = max(32 * 1024 * 1024, min((vmem_cap * 3) // 4, 96 * 1024 * 1024))

    labels_knhw = jnp.transpose(labels_nkhw, (1, 0, 2, 3))     # (K, N, H, W) layout glue

    out_shape = jax.ShapeDtypeStruct((k, 1, 128), jnp.float32)  # lane-dense per-class slots
    out_spec = pl.BlockSpec((1, 1, 128), lambda i: (i, 0, 0))
    cparams = pltpu.CompilerParams(dimension_semantics=("parallel",),
                                   vmem_limit_bytes=vmem_limit)

    if use_dense:
        # Dense kron operator: conv(x).flatten() == kron(A_H, A_W) @ x.flatten().
        a_h = build_conv_matrix_1d(h, radius, sigma_1)
        a_w = build_conv_matrix_1d(w, radius, sigma_1)
        g = jnp.asarray(np.kron(a_h, a_w), dtype=jnp.bfloat16)              # (HW, HW)
        labels_flat = labels_knhw.reshape(k, n, hw)                         # lane-flat
        inputs_flat = inputs_nchw.reshape(n, c, hw)
        kernel_fn = functools.partial(_ncut_dense_kernel, sigma_2=float(sigma_2))
        ratios = pl.pallas_call(
            kernel_fn,
            out_shape=out_shape,
            grid_spec=pltpu.PrefetchScalarGridSpec(
                num_scalar_prefetch=0,
                grid=(k,),
                in_specs=[
                    pl.BlockSpec((1, n, hw), lambda i: (i, 0, 0)),      # labels, per class
                    pl.BlockSpec((n, c, hw), lambda i: (0, 0, 0)),      # inputs, resident
                    pl.BlockSpec((hw, hw), lambda i: (0, 0)),           # G, resident
                ],
                out_specs=out_spec),
            compiler_params=cparams,
        )(labels_flat, inputs_flat, g)
    else:
        a_h = jnp.asarray(build_conv_matrix_1d(h, radius, sigma_1), dtype=jnp.bfloat16)
        a_w = jnp.asarray(build_conv_matrix_1d(w, radius, sigma_1), dtype=jnp.bfloat16)
        kernel_fn = functools.partial(_ncut_sep_kernel, sigma_2=float(sigma_2))
        ratios = pl.pallas_call(
            kernel_fn,
            out_shape=out_shape,
            grid_spec=pltpu.PrefetchScalarGridSpec(
                num_scalar_prefetch=0,
                grid=(k,),
                in_specs=[
                    pl.BlockSpec((1, n, h, w), lambda i: (i, 0, 0, 0)),  # labels, per class
                    pl.BlockSpec((n, c, h, w), lambda i: (0, 0, 0, 0)),  # inputs, resident
                    pl.BlockSpec((h, h), lambda i: (0, 0)),              # A_H
                    pl.BlockSpec((w, w), lambda i: (0, 0)),              # A_W
                ],
                out_specs=out_spec),
            compiler_params=cparams,
        )(labels_knhw, inputs_nchw, a_h, a_w)

    # loss = num_classes - sum_k |numer_k / (denom_k + 1e-6)|
    return jnp.float32(k) - jnp.sum(ratios[:, 0, 0])


# ----------------------------------------------------------------------------
# Pure-JAX reference (mirrors the PyTorch forward: NCHW + conv2d with padding=radius)
# ----------------------------------------------------------------------------
def ncut_reference(labels_nkhw, inputs_nchw, k2d, sigma_2):
    n, k, h, w = labels_nkhw.shape
    r = (k2d.shape[0] - 1) // 2
    kern = jnp.asarray(k2d)[None, None]  # (1, 1, kh, kw)

    def conv(x):
        return jax.lax.conv_general_dilated(
            x, kern, window_strides=(1, 1), padding=[(r, r), (r, r)],
            dimension_numbers=("NCHW", "OIHW", "NCHW"))

    loss = jnp.float32(0.0)
    for kk in range(k):
        cp = labels_nkhw[:, kk:kk + 1]                                      # (N,1,H,W)
        cm = (jnp.mean(inputs_nchw * cp, axis=(2, 3), keepdims=True)
              / (jnp.mean(cp, axis=(2, 3), keepdims=True) + 1e-5))          # (N,C,1,1)
        diff = jnp.sum((inputs_nchw - cm) ** 2, axis=1, keepdims=True)      # (N,1,H,W)
        wts = jnp.exp(-(diff ** 2) / sigma_2 ** 2)
        a12 = conv(cp * wts)
        numer = jnp.sum(cp * a12)
        denom = jnp.sum(cp * conv(wts))
        loss = loss + jnp.abs(numer / (denom + 1e-6))
    return k - loss


if __name__ == "__main__":
    # Small shapes consistent with the module's forward pass.
    N, K, C, H, W = 2, 4, 3, 16, 16
    radius, sigma_1, sigma_2 = 4, 5.0, 1.0

    key = jax.random.PRNGKey(0)
    key_a, key_b = jax.random.split(key)
    inputs = jax.random.uniform(key_a, (N, C, H, W), jnp.float32)            # raw "images"
    labels = jax.nn.softmax(jax.random.normal(key_b, (N, K, H, W), jnp.float32), axis=1)

    k1d = gaussian_kernel_1d(radius, sigma_1)
    k2d = np.outer(k1d, k1d).astype(np.float32)       # the module's 2-D gaussian_kernel

    # ---- primary test: dense-kron / lane-flat path (the fast path for small images)
    out = ncut_loss_pallas(labels, inputs, radius=radius, sigma_1=sigma_1, sigma_2=sigma_2)
    out = jax.block_until_ready(out)
    ref = ncut_reference(labels, inputs, k2d, sigma_2)
    # Tolerance accounts for bf16 MXU operands; all VPU math (means/exp/ratios) is f32.
    np.testing.assert_allclose(np.asarray(out), np.asarray(ref), rtol=5e-3, atol=2e-3)

    # ---- secondary test: force the separable (large-image) path at a small shape
    H2 = W2 = 32
    key_c, key_d = jax.random.split(key_b)
    inputs2 = jax.random.uniform(key_c, (N, C, H2, W2), jnp.float32)
    labels2 = jax.nn.softmax(jax.random.normal(key_d, (N, K, H2, W2), jnp.float32), axis=1)
    out2 = jax.block_until_ready(
        ncut_loss_pallas(labels2, inputs2, radius=radius, sigma_1=sigma_1,
                         sigma_2=sigma_2, force_separable=True))
    ref2 = ncut_reference(labels2, inputs2, k2d, sigma_2)
    np.testing.assert_allclose(np.asarray(out2), np.asarray(ref2), rtol=5e-3, atol=2e-3)

    print("KERNEL_OK")
</pallas_src>

<mosaic_0001>
module attributes {stable_mosaic.version = 11 : i64} {
  func.func @_ncut_dense_kernel(%arg0: i32, %arg1: memref<1x2x256xf32, #tpu.memory_space<vmem>>, %arg2: memref<2x3x256xf32, #tpu.memory_space<vmem>>, %arg3: memref<256x256xbf16, #tpu.memory_space<vmem>>, %arg4: memref<1x1x128xf32, #tpu.memory_space<vmem>>) attributes {dimension_semantics = [#tpu.dimension_semantics<parallel>], iteration_bounds = array<i64: 4>, scalar_prefetch = 0 : i64, scratch_operands = 0 : i64, tpu.core_type = #tpu.core_type<tc>, window_params = [{transform_indices = @transform_0, window_bounds = array<i64: 1, 2, 256>}, {pipeline_mode = #tpu.pipeline_mode<synchronous>, transform_indices = @transform_1, window_bounds = array<i64: 2, 3, 256>}, {pipeline_mode = #tpu.pipeline_mode<synchronous>, transform_indices = @transform_2, window_bounds = array<i64: 256, 256>}, {transform_indices = @transform_3, window_bounds = array<i64: 1, 1, 128>}]} {
    %c0 = arith.constant 0 : index
    %c0_0 = arith.constant 0 : index
    %c0_1 = arith.constant 0 : index
    %0 = vector.load %arg1[%c0, %c0_0, %c0_1] : memref<1x2x256xf32, #tpu.memory_space<vmem>>, vector<1x2x256xf32>
    %1 = vector.shape_cast %0 : vector<1x2x256xf32> to vector<2x256xf32>
    %c0_2 = arith.constant 0 : index
    %c0_3 = arith.constant 0 : index
    %c0_4 = arith.constant 0 : index
    %2 = vector.load %arg2[%c0_2, %c0_3, %c0_4] : memref<2x3x256xf32, #tpu.memory_space<vmem>>, vector<2x3x256xf32>
    %cst = arith.constant dense<0.000000e+00> : vector<2xf32>
    %3 = vector.multi_reduction <add>, %1, %cst [1] : vector<2x256xf32> to vector<2xf32>
    %cst_5 = arith.constant 3.906250e-03 : f32
    %4 = vector.broadcast %cst_5 : f32 to vector<2xf32>
    %5 = arith.mulf %3, %4 : vector<2xf32>
    %cst_6 = arith.constant 9.99999974E-6 : f32
    %6 = vector.broadcast %cst_6 : f32 to vector<2xf32>
    %7 = arith.addf %5, %6 : vector<2xf32>
    %cst_7 = arith.constant 0.000000e+00 : f32
    %8 = vector.broadcast %cst_7 : f32 to vector<2x256xf32>
    %cst_8 = arith.constant 0.000000e+00 : f32
    %9 = vector.broadcast %cst_8 : f32 to vector<2x256xf32>
    %cst_9 = arith.constant 0.000000e+00 : f32
    %10 = vector.broadcast %cst_9 : f32 to vector<2xf32>
    %11 = vector.extract_strided_slice %2 {offsets = [0, 0, 0], sizes = [2, 1, 256], strides = [1, 1, 1]} : vector<2x3x256xf32> to vector<2x1x256xf32>
    %12 = vector.shape_cast %11 : vector<2x1x256xf32> to vector<2x256xf32>
    %13 = arith.mulf %1, %12 : vector<2x256xf32>
    %cst_10 = arith.constant dense<0.000000e+00> : vector<2xf32>
    %14 = vector.multi_reduction <add>, %13, %cst_10 [1] : vector<2x256xf32> to vector<2xf32>
    %cst_11 = arith.constant 3.906250e-03 : f32
    %15 = vector.broadcast %cst_11 : f32 to vector<2xf32>
    %16 = arith.mulf %14, %15 : vector<2xf32>
    %17 = arith.divf %16, %7 : vector<2xf32>
    %18 = arith.mulf %12, %12 : vector<2x256xf32>
    %19 = arith.addf %8, %18 : vector<2x256xf32>
    %20 = vector.shape_cast %17 : vector<2xf32> to vector<2x1xf32>
    %21 = vector.broadcast %20 : vector<2x1xf32> to vector<2x256xf32>
    %22 = arith.mulf %12, %21 : vector<2x256xf32>
    %23 = arith.addf %9, %22 : vector<2x256xf32>
    %24 = arith.mulf %17, %17 : vector<2xf32>
    %25 = arith.addf %10, %24 : vector<2xf32>
    %26 = vector.extract_strided_slice %2 {offsets = [0, 1, 0], sizes = [2, 1, 256], strides = [1, 1, 1]} : vector<2x3x256xf32> to vector<2x1x256xf32>
    %27 = vector.shape_cast %26 : vector<2x1x256xf32> to vector<2x256xf32>
    %28 = arith.mulf %1, %27 : vector<2x256xf32>
    %cst_12 = arith.constant dense<0.000000e+00> : vector<2xf32>
    %29 = vector.multi_reduction <add>, %28, %cst_12 [1] : vector<2x256xf32> to vector<2xf32>
    %cst_13 = arith.constant 3.906250e-03 : f32
    %30 = vector.broadcast %cst_13 : f32 to vector<2xf32>
    %31 = arith.mulf %29, %30 : vector<2xf32>
    %32 = arith.divf %31, %7 : vector<2xf32>
    %33 = arith.mulf %27, %27 : vector<2x256xf32>
    %34 = arith.addf %19, %33 : vector<2x256xf32>
    %35 = vector.shape_cast %32 : vector<2xf32> to vector<2x1xf32>
    %36 = vector.broadcast %35 : vector<2x1xf32> to vector<2x256xf32>
    %37 = arith.mulf %27, %36 : vector<2x256xf32>
    %38 = arith.addf %23, %37 : vector<2x256xf32>
    %39 = arith.mulf %32, %32 : vector<2xf32>
    %40 = arith.addf %25, %39 : vector<2xf32>
    %41 = vector.extract_strided_slice %2 {offsets = [0, 2, 0], sizes = [2, 1, 256], strides = [1, 1, 1]} : vector<2x3x256xf32> to vector<2x1x256xf32>
    %42 = vector.shape_cast %41 : vector<2x1x256xf32> to vector<2x256xf32>
    %43 = arith.mulf %1, %42 : vector<2x256xf32>
    %cst_14 = arith.constant dense<0.000000e+00> : vector<2xf32>
    %44 = vector.multi_reduction <add>, %43, %cst_14 [1] : vector<2x256xf32> to vector<2xf32>
    %cst_15 = arith.constant 3.906250e-03 : f32
    %45 = vector.broadcast %cst_15 : f32 to vector<2xf32>
    %46 = arith.mulf %44, %45 : vector<2xf32>
    %47 = arith.divf %46, %7 : vector<2xf32>
    %48 = arith.mulf %42, %42 : vector<2x256xf32>
    %49 = arith.addf %34, %48 : vector<2x256xf32>
    %50 = vector.shape_cast %47 : vector<2xf32> to vector<2x1xf32>
    %51 = vector.broadcast %50 : vector<2x1xf32> to vector<2x256xf32>
    %52 = arith.mulf %42, %51 : vector<2x256xf32>
    %53 = arith.addf %38, %52 : vector<2x256xf32>
    %54 = arith.mulf %47, %47 : vector<2xf32>
    %55 = arith.addf %40, %54 : vector<2xf32>
    %cst_16 = arith.constant 2.000000e+00 : f32
    %56 = vector.broadcast %cst_16 : f32 to vector<2x256xf32>
    %57 = arith.mulf %56, %53 : vector<2x256xf32>
    %58 = arith.subf %49, %57 : vector<2x256xf32>
    %59 = vector.shape_cast %55 : vector<2xf32> to vector<2x1xf32>
    %60 = vector.broadcast %59 : vector<2x1xf32> to vector<2x256xf32>
    %61 = arith.addf %58, %60 : vector<2x256xf32>
    %62 = arith.mulf %61, %61 : vector<2x256xf32>
    %cst_17 = arith.constant 0.000000e+00 : f32
    %63 = vector.broadcast %cst_17 : f32 to vector<2x256xf32>
    %64 = arith.subf %63, %62 : vector<2x256xf32>
    %cst_18 = arith.constant 1.000000e+00 : f32
    %65 = vector.broadcast %cst_18 : f32 to vector<2x256xf32>
    %66 = arith.mulf %64, %65 : vector<2x256xf32>
    %67 = math.exp %66 : vector<2x256xf32>
    %68 = arith.truncf %1 : vector<2x256xf32> to vector<2x256xbf16>
    %c0_19 = arith.constant 0 : index
    %c0_20 = arith.constant 0 : index
    %69 = vector.load %arg3[%c0_19, %c0_20] : memref<256x256xbf16, #tpu.memory_space<vmem>>, vector<256x256xbf16>
    %cst_21 = arith.constant dense<0.000000e+00> : vector<2x256xf32>
    %70 = tpu.matmul %68, %69, %cst_21 {dimension_numbers = #tpu.dot_dimension_numbers<[1], [0], [0], [1], [0, 0, 1, 1], [], []>} : vector<2x256xbf16>, vector<256x256xbf16>, vector<2x256xf32> -> vector<2x256xf32>
    %71 = arith.mulf %70, %67 : vector<2x256xf32>
    %72 = arith.mulf %71, %1 : vector<2x256xf32>
    %73 = vector.shape_cast %72 : vector<2x256xf32> to vector<1x2x256xf32>
    %cst_22 = arith.constant dense<0.000000e+00> : vector<1xf32>
    %74 = vector.multi_reduction <add>, %73, %cst_22 [1, 2] : vector<1x2x256xf32> to vector<1xf32>
    %75 = vector.shape_cast %74 : vector<1xf32> to vector<1x1x1xf32>
    %76 = vector.extract %75[0, 0, 0] : f32 from vector<1x1x1xf32>
    %77 = vector.shape_cast %71 : vector<2x256xf32> to vector<1x2x256xf32>
    %cst_23 = arith.constant dense<0.000000e+00> : vector<1xf32>
    %78 = vector.multi_reduction <add>, %77, %cst_23 [1, 2] : vector<1x2x256xf32> to vector<1xf32>
    %79 = vector.shape_cast %78 : vector<1xf32> to vector<1x1x1xf32>
    %80 = vector.extract %79[0, 0, 0] : f32 from vector<1x1x1xf32>
    %cst_24 = arith.constant 9.99999997E-7 : f32
    %81 = arith.addf %80, %cst_24 : f32
    %82 = arith.divf %76, %81 : f32
    %83 = math.absf %82 : f32
    %84 = vector.broadcast %83 : f32 to vector<1x1x128xf32>
    %c0_25 = arith.constant 0 : index
    %c0_26 = arith.constant 0 : index
    %c0_27 = arith.constant 0 : index
    %85 = vector.load %arg4[%c0_25, %c0_26, %c0_27] : memref<1x1x128xf32, #tpu.memory_space<vmem>>, vector<1x1x128xf32>
    tpu.vector_store %arg4[%c0_25, %c0_26, %c0_27], %84 {strides = array<i32>} : memref<1x1x128xf32, #tpu.memory_space<vmem>>, vector<1x1x128xf32>,
    return
  }
  func.func @transform_0(%arg0: i32) -> (i32, i32, i32) {
    %c0_i32 = arith.constant 0 : i32
    %c0_i32_0 = arith.constant 0 : i32
    %c0_i32_1 = arith.constant 0 : i32
    return %arg0, %c0_i32, %c0_i32_0 : i32, i32, i32
  }
  func.func @transform_1(%arg0: i32) -> (i32, i32, i32) {
    %c0_i32 = arith.constant 0 : i32
    %c0_i32_0 = arith.constant 0 : i32
    %c0_i32_1 = arith.constant 0 : i32
    %c0_i32_2 = arith.constant 0 : i32
    return %c0_i32, %c0_i32_0, %c0_i32_1 : i32, i32, i32
  }
  func.func @transform_2(%arg0: i32) -> (i32, i32) {
    %c0_i32 = arith.constant 0 : i32
    %c0_i32_0 = arith.constant 0 : i32
    %c0_i32_1 = arith.constant 0 : i32
    return %c0_i32, %c0_i32_0 : i32, i32
  }
  func.func @transform_3(%arg0: i32) -> (i32, i32, i32) {
    %c0_i32 = arith.constant 0 : i32
    %c0_i32_0 = arith.constant 0 : i32
    %c0_i32_1 = arith.constant 0 : i32
    return %arg0, %c0_i32, %c0_i32_0 : i32, i32, i32
  }
}

</mosaic_0001>

<bundles_post_ra>
// kernel: tpu_custom_call.1
= control target key start
LH: loop header
LB: loop body
LE: loop exit
PB: predicated region body
PF: predicated region fallthrough
CT: control target
= control target key end

     0   :  { %8 = vsyncpa [#allocation3], 0  ;;  %s1300_s0 = inlined_call_operand.vmem [shape: f32[4,2,256], index: 0, kind: input, shape index: {}]   ;;  %s1301_s1 = inlined_call_operand.vmem [shape: f32[2,3,256], index: 1, kind: input, shape index: {}]   ;;  %s1302_s2 = inlined_call_operand.hbm [shape: bf16[256,256], index: 2, kind: input, shape index: {}]   ;;  %s1303_s3 = inlined_call_operand.hbm [shape: f32[4,1,128], index: 3, kind: output, shape index: {}]  }
   0x1   :  { %9 = vsyncpa [#allocation4], 0 }
   0x2   :  { %11 = vsyncpa [#allocation4 + $0x1], 0  ;;  %s1089_s12 = smov 0   ;;  %s1091_s13 = smov 0  }
   0x3   :  { %s1093_s14 = smov 0   ;;  %s1095_s15 = smov 0  }
   0x4 LB: > { %s1110_s16 = sadd.s32 4294967295, %s1061_s15   ;;  %s799_s17 = sadd.s32 4294967294, %s1061_s15   ;;  %s1061_s15 = sphi %s1095_s15, %s1319_s15   ;;  %s1057_s14 = sphi %s1093_s14, %s1318_s14   ;;  %s1053_s13 = sphi %s1091_s13, %s1317_s13   ;;  %s1049_s12 = sphi %s1089_s12, %s1316_s12  }
   0x5   : > { %s1114_s18 = sadd.s32 1, %s1061_s15   ;;  %s92_s19 = sadd.s32 1, %s1057_s14 }
   0x6   : > { %s89_s20 = ssub.s32 %s1061_s15, %s1114_s18  ;;  %p102_p0 = scmp.ne.s32.totalorder %s1057_s14, %s1053_s13 }
   0x7   : > { %p90_p1 = scmp.eq.s32.totalorder %s89_s20, 0  ;;  %p103_p2 = scmp.eq.s32.totalorder %s1110_s16, 3 }
   0x8   : > { %p108_p3 = scmp.ne.s32.totalorder %s1053_s13, %s1049_s12  ;;  %p109_p4 = scmp.eq.s32.totalorder %s799_s17, 3 }
   0x9   : > { %s1125_s21 = scalar_select %p90_p1, %s1057_s14, %s92_s19  }
   0xa   : > { %p1127_p5 = por %p103_p2, %p102_p0  ;;  %p1131_p6 = por %p109_p4, %p108_p3 }
   0xb   : > { %p800_p7 = scmp.ge.s32.totalorder %s1061_s15, 1  ;;  %p116_p8 = scmp.lt.s32.totalorder %s1061_s15, 5 }
   0xc   : > { %s1307_s22 = scalar_select %p1127_p5, 1, 0 }
   0xd   : > { %s1308_s23 = scalar_select %p1131_p6, 1, 0 }
   0xe   : > { %p1304_p9 = scmp.eq.s32.totalorder %s1110_s16, 0  ;;  %p1138_p10 = pnand %p800_p7, %p116_p8 }
   0xf   : > { %s1063_s25 = smov [#allocation2]   ;;  %s967_s30 = scalar_lea.hbm %s1302_s2, 4096 }
  0x10   : > { %s1309_s24 = scalar_select %p1138_p10, 1, 0 }
  0x11   : > { %s131_s26 = sshll.u32 %s1063_s25, 4  ;;  %p863_p11 = pneg %p1138_p10  ;;  %s132_s26 = int_to_ptr.vmem [resolvable:$true] %s131_s26 }
  0x12   : > { %p968_p13 = scmp.ne.s32.totalorder %s1302_s2, %s967_s30  ;;  %p974_p3 = scmp.lt.u32.totalorder %s967_s30, %s1302_s2 }
  0x13   : > { %p1146_p12 = pnand %p1304_p9, %p863_p11 }
  0x15   : > { %p969_p0 = pneg %p1146_p12 }
  0x17   : > { %p970_p1 = pnand %p969_p0, %p968_p13 }
  0x19   : > { %p971_p2 = pneg %p970_p1 }
  0x1b   : > { %p976_p4 = pnand %p974_p3, %p971_p2 }
  0x1d   : > { %979 = shalt.err (!%p976_p4)
}
  0x1e   : > { %s980_s8 = scalar_lea.vmem %s132_s26, 4096  ;;  %p988_p9 = scmp.lt.s32.totalorder %s132_s26, %s132_s26 }
  0x1f   : > { %p981_p7 = scmp.ne.s32.totalorder %s132_s26, %s980_s8  ;;  %p989_p6 = scmp.lt.s32.totalorder %s980_s8, %s980_s8 }
  0x21   : > { %p983_p8 = pnand %p981_p7, %p969_p0  ;;  %p990_p5 = por %p989_p6, %p988_p9 }
  0x23   : > { %p984_p11 = pneg %p983_p8 }
  0x25   : > { %p991_p10 = pnand %p990_p5, %p984_p11 }
  0x27   : > { %994 = shalt.err (!%p991_p10)
}
  0x28   : > { %s1064_s9 = smov 128   ;;  %s1065_s10 = smov 8  }
  0x29   : > { %866 = dma.hbm_to_vmem [thread:$0]  (!%p1146_p12), %s1302_s2, 4096, %s132_s26, [#allocation3], %s1064_s9, %s1064_s9, %s1065_s10  }
  0x2a   : > { %p1311_p13 = scmp.ne.s32.totalorder %s1309_s24, 0 }
  0x2b   : > { %p1312_p1 = scmp.eq.s32.totalorder (!%p1311_p13), %s1110_s16, 0 }
  0x2c   : > { %155 = sbr.rel (%p1311_p13) target bundleno = 624 (0x270), region = 32 }
  0x33   : > { %1040 = dma.done.wait (%p1312_p1), [#allocation3], 4096   ;;  %p1313_p0 = pmov %p1312_p1 }
  0x34   : > { %v911_v0 = vld [vmem:[#allocation2 + $0x4] ss:$8 sps:$4 sm:$0xff]   ;;  %v913_v1 = vld [vmem:[#allocation2] ss:$8 sps:$4 sm:$0xff]   ;;  %v914_v2 = vld [vmem:[#allocation2 + $0x14] ss:$8 sps:$4 sm:$0xff]   ;;  %v190_v9 = vlaneseq }
  0x35   : > { %1042 = vsyncadd (%p1313_p0), [#allocation3], 4294963200  ;;  %620 = vmatprep.subr.bf16.mxu0 %v911_v0  ;;  %v916_v3 = vld [vmem:[#allocation2 + $0x10] ss:$8 sps:$4 sm:$0xff]   ;;  %v917_v4 = vld [vmem:[#allocation2 + $0x24] ss:$8 sps:$4 sm:$0xff]  }
  0x36   : > { %621 = vmatpush1.bf16.msra.mxu0 %v913_v1  ;;  %v919_v5 = vld [vmem:[#allocation2 + $0x20] ss:$8 sps:$4 sm:$0xff]   ;;  %p178_p5 = scmp.lt.s32.totalorder %s1110_s16, 3  ;;  %v920_v6 = vld [vmem:[#allocation2 + $0x34] ss:$8 sps:$4 sm:$0xff]   ;;  %v1174_v13 = vshrl.u32 %v190_v9, 7 }
  0x37   : > { %622 = vmatprep.subr.bf16.mxu0 %v914_v2  ;;  %v1066_v7 = vmov 1983009808   ;;  %v922_v10 = vld [vmem:[#allocation2 + $0x30] ss:$8 sps:$4 sm:$0xff]   ;;  %v923_v11 = vld [vmem:[#allocation2 + $0x44] ss:$8 sps:$4 sm:$0xff]  }
  0x38   : > { %v188_v8 = vunpack.c.l.s4 %v1066_v7  ;;  %s179_s19 = scalar_select %p178_p5, %s1110_s16, 3  ;;  %v925_v14 = vld [vmem:[#allocation2 + $0x40] ss:$8 sps:$4 sm:$0xff]   ;;  %v926_v15 = vld [vmem:[#allocation2 + $0x54] ss:$8 sps:$4 sm:$0xff]   ;;  %vm197_vm0 = vcmask 1041408  }
  0x39   : > { %v928_v17 = vld [vmem:[#allocation2 + $0x50] ss:$8 sps:$4 sm:$0xff]   ;;  %v929_v18 = vld [vmem:[#allocation2 + $0x64] ss:$8 sps:$4 sm:$0xff]   ;;  %v931_v24 = vld [vmem:[#allocation2 + $0x60] ss:$8 sps:$4 sm:$0xff]  }
  0x3a   : > { %623 = vmatpush1.bf16.msra.mxu0 %v916_v3  ;;  %v189_v12 = vunpack.c.0.s8 %v188_v8  ;;  %s850_s20 = sshll.u32 %s179_s19, 2  ;;  %v1185_v20 = vld [vmem:[%s1301_s1] sm:$0x77]  ;;  %v1193_v22 = vld [vmem:[%s1301_s1 + $0x8] sm:$0x77]  ;;  %vm226_vm1 = vcmask 1041409  }
  0x3b   : > { %624 = vmatprep.subr.bf16.mxu0 %v917_v4  ;;  %s182_s26 = scalar_lea.vmem %s1300_s0, %s850_s20  ;;  %v932_v26 = vld [vmem:[#allocation2 + $0x74] ss:$8 sps:$4 sm:$0xff]   ;;  %vm228_vm2 = vcmask 1043459   ;;  %vm230_vm3 = vcmask 1045509   ;;  %vm232_vm4 = vcmask 1047559   ;;  %s176_s7 = sand.u32 1, %s1053_s13  }
  0x3c   : > { %v1180_v16 = vsub.s32 %v189_v12, %v1174_v13  ;;  %v183_v19 = vld [vmem:[%s182_s26] sm:$0xf]  ;;  %v934_v36 = vld [vmem:[#allocation2 + $0x70] ss:$8 sps:$4 sm:$0xff]   ;;  %v935_v41 = vld [vmem:[#allocation2 + $0x84] ss:$8 sps:$4 sm:$0xff]  }
  0x3d   : > { %v937_v50 = vld [vmem:[#allocation2 + $0x80] ss:$8 sps:$4 sm:$0xff]   ;;  %v938_v53 = vld [vmem:[#allocation2 + $0x94] ss:$8 sps:$4 sm:$0xff]   ;;  %v940_v60 = vld [vmem:[#allocation2 + $0x90] ss:$8 sps:$4 sm:$0xff]  }
  0x3e   : > { %625 = vmatpush1.bf16.msra.mxu0 %v919_v5  ;;  %v1188_v21 = vrot.slane %v183_v19, %v1180_v16  ;;  %v213_v23 = vrot.slane %v1185_v20, %v1180_v16  ;;  %v220_v25 = vrot.slane %v1193_v22, %v1180_v16  ;;  %v941_v0 = vld [vmem:[#allocation2 + $0xa4] ss:$8 sps:$4 sm:$0xff]   ;;  %v943_v7 = vld [vmem:[#allocation2 + $0xa0] ss:$8 sps:$4 sm:$0xff]   ;;  %v944_v9 = vld [vmem:[#allocation2 + $0xb4] ss:$8 sps:$4 sm:$0xff]  }
  0x3f   : > { %626 = vmatprep.subr.bf16.mxu0 %v920_v6  ;;  %v947_v12 = vld [vmem:[#allocation2 + $0xc4] ss:$8 sps:$4 sm:$0xff]   ;;  %s847_s8 = sshll.u32 %s1110_s16, 4  ;;  %s177_s10 = scalar_lea.vmem [#allocation5], %s176_s7 }
  0x40   : > { %v1201_v27 = vcombine.high %v1188_v21, %v1188_v21  ;;  %v198_v28 = vsel %vm197_vm0, %v1188_v21, 0.0  ;;  %v276_v29 = vrot.slane %v213_v23, 1  ;;  %v225_v30 = vrot.slane %v220_v25, 7  ;;  %s732_s11 = sshll.u32 %s177_s10, 4  ;;  %s1258_s24 = scalar_lea.hbm %s1303_s3, %s847_s8  ;;  %s1260_s11 = int_to_ptr.vmem [resolvable:$true] %s732_s11 }
  0x41   : > { %v338_v31 = vcombine.high %v213_v23, %v213_v23  ;;  %v339_v32 = vcombine.high %v220_v25, %v220_v25  ;;  %s720_s26 = scalar_lea.sflag [#allocation4], %s176_s7  ;;  %s995_s27 = scalar_lea.vmem %s1260_s11, 16 }
  0x42   : > { %627 = vmatpush1.bf16.msra.mxu0 %v922_v10  ;;  %v427_v33 = vpack.c.bf16 %v1201_v27, %v1201_v27  ;;  %v199_v34 = vsel %vm197_vm0, %v1201_v27, 0.0  ;;  %v279_v35 = vsel %vm226_vm1, %v220_v25, %v276_v29  ;;  %v227_v38 = vsel %vm226_vm1, %v225_v30, %v213_v23  ;;  %v958_v23 = vld [vmem:[#allocation2 + $0xf0] ss:$8 sps:$4 sm:$0xff]   ;;  %p996_p6 = scmp.ne.s32.totalorder %s1260_s11, %s995_s27  ;;  %p1314_p9 = scmp.ne.s32.totalorder %s1307_s22, 0 }
  0x43   : > { %628 = vmatprep.subr.bf16.mxu0 %v923_v11  ;;  %v200_v37 = vadd.f32 %v199_v34, %v198_v28  ;;  %v280_v39 = vsel %vm228_vm2, %v220_v25, %v279_v35  ;;  %v342_v40 = vrot.slane %v339_v32, 7  ;;  %v229_v42 = vsel %vm228_vm2, %v225_v30, %v227_v38  ;;  %v946_v11 = vld [vmem:[#allocation2 + $0xb0] ss:$8 sps:$4 sm:$0xff]   ;;  %s1068_s16 = smov [#allocation5]  }
  0x44   : > { %652 = vmatprep.mubr.bf16.mxu0 %v427_v33  ;;  %v281_v43 = vsel %vm230_vm3, %v220_v25, %v280_v39  ;;  %v231_v44 = vsel %vm230_vm3, %v225_v30, %v229_v42  ;;  %p997_p10 = pnand %p996_p6, %p1314_p9  ;;  %s999_s28 = sshll.u32 %s1068_s16, 4  ;;  %s1000_s28 = int_to_ptr.vmem [resolvable:$false] %s999_s28 }
  0x45   : > { %201 = vadd.xlane.f32.xlu0 %v200_v37  ;;  %v282_v45 = vsel %vm232_vm4, %v220_v25, %v281_v43  ;;  %v343_v46 = vsel %vm226_vm1, %v342_v40, %v338_v31  ;;  %v233_v47 = vsel %vm232_vm4, %v225_v30, %v231_v44  ;;  %v1067_v30 = vmov 839922192   ;;  %s1001_s29 = scalar_lea.vmem %s1000_s28, 32  ;;  %p1002_p2 = scmp.lt.s32.totalorder %s1260_s11, %s1000_s28 }
  0x46   : > { %629 = vmatpush1.bf16.msra.mxu0 %v925_v14  ;;  %v284_v48 = vmul.f32 %v282_v45, %v183_v19  ;;  %v344_v49 = vsel %vm228_vm2, %v342_v40, %v343_v46  ;;  %v235_v51 = vmul.f32 %v233_v47, %v183_v19  ;;  %v949_v14 = vld [vmem:[#allocation2 + $0xc0] ss:$8 sps:$4 sm:$0xff]   ;;  %v261_v31 = vunpack.c.l.s4 %v1067_v30  ;;  %p998_p12 = pneg %p997_p10  ;;  %p1003_p3 = scmp.lt.s32.totalorder %s1001_s29, %s995_s27 }
  0x47   : > { %630 = vmatprep.subr.bf16.mxu0 %v926_v15  ;;  %v345_v52 = vsel %vm230_vm3, %v342_v40, %v344_v49  ;;  %v950_v15 = vld [vmem:[#allocation2 + $0xd4] ss:$8 sps:$4 sm:$0xff]  }
  0x48   : > { %v292_v54 = vrot.slane %v284_v48, %v1180_v16  ;;  %v346_v55 = vsel %vm232_vm4, %v342_v40, %v345_v52  ;;  %v243_v56 = vrot.slane %v235_v51, %v1180_v16  ;;  %v262_v33 = vunpack.c.0.s8 %v261_v31  ;;  %p1004_p4 = por %p1003_p3, %p1002_p2 }
  0x49   : > { %v348_v57 = vmul.f32 %v346_v55, %v183_v19  ;;  %v956_v19 = vld [vmem:[#allocation2 + $0xf4] ss:$8 sps:$4 sm:$0xff]   ;;  %v255_v52 = vmul.f32 %v1185_v20, %v1185_v20 }
  0x4a   : > { %631 = vmatpush1.bf16.msra.mxu0 %v928_v17  ;;  %v293_v58 = vcombine.high %v292_v54, %v292_v54  ;;  %v296_v59 = vsel %vm197_vm0, %v292_v54, 0.0  ;;  %v244_v61 = vcombine.high %v243_v56, %v243_v56  ;;  %v247_v62 = vsel %vm197_vm0, %v243_v56, 0.0  ;;  %v953_v17 = vld [vmem:[#allocation2 + $0xe4] ss:$8 sps:$4 sm:$0xff]   ;;  %p1005_p7 = pnand %p1004_p4, %p998_p12 }
  0x4b   : > { %632 = vmatprep.subr.bf16.mxu0 %v929_v18  ;;  %v356_v63 = vrot.slane %v348_v57, %v1180_v16  ;;  %v952_v16 = vld [vmem:[#allocation2 + $0xd0] ss:$8 sps:$4 sm:$0xff]   ;;  %v955_v18 = vld [vmem:[#allocation2 + $0xe0] ss:$8 sps:$4 sm:$0xff]   ;;  %v265_v37 = vsub.s32 %v262_v33, %v1174_v13  ;;  %v665_v33 = vsub.s32 0, %v1174_v13 }
  0x4c   : > { %v297_v1 = vsel %vm197_vm0, %v293_v58, 0.0  ;;  %v248_v2 = vsel %vm197_vm0, %v244_v61, 0.0 }
  0x4d   : > { %v298_v3 = vadd.f32 %v297_v1, %v296_v59  ;;  %v357_v4 = vcombine.high %v356_v63, %v356_v63  ;;  %v360_v5 = vsel %vm197_vm0, %v356_v63, 0.0  ;;  %v249_v6 = vadd.f32 %v248_v2, %v247_v62 }
  0x4e   : > { %633 = vmatpush1.bf16.msra.mxu0 %v931_v24  ;;  %v426_v24 = vpack.c.bf16 %v1188_v21, %v1188_v21  ;;  %v807_v63 = vrot.slane %v255_v52, 9 }
  0x4f   : > { %634 = vmatprep.subr.bf16.mxu0 %v932_v26  ;;  %299 = vadd.xlane.f32.xlu0 %v298_v3  ;;  %v361_v8 = vsel %vm197_vm0, %v357_v4, 0.0 }
  0x50   : > { %250 = vadd.xlane.f32.xlu1 %v249_v6  ;;  %v362_v10 = vadd.f32 %v361_v8, %v360_v5  ;;  %v311_v6 = vadd.f32 %v807_v63, %v255_v52 }
  0x52   : > { %635 = vmatpush1.bf16.msra.mxu0 %v934_v36 }
  0x53   : > { %636 = vmatprep.subr.bf16.mxu0 %v935_v41 }
  0x54   : > { %363 = vadd.xlane.f32.xlu1 %v362_v10 }
  0x56   : > { %637 = vmatpush1.bf16.msra.mxu0 %v937_v50 }
  0x57   : > { %638 = vmatprep.subr.bf16.mxu0 %v938_v53  ;;  %v256_v53 = vmul.f32 %v1193_v22, %v1193_v22 }
  0x59   : > { %v812_v10 = vrot.slane %v256_v53, 10 }
  0x5a   : > { %639 = vmatpush1.bf16.msra.mxu0 %v940_v60 }
  0x5b   : > { %640 = vmatprep.subr.bf16.mxu0 %v941_v0  ;;  %v808_v0 = vrot.slane %v256_v53, 9 }
  0x5e   : > { %641 = vmatpush1.bf16.msra.mxu0 %v943_v7  ;;  %v811_v7 = vrot.slane %v255_v52, 10 }
  0x5f   : > { %642 = vmatprep.subr.bf16.mxu0 %v944_v9  ;;  %v312_v9 = vadd.f32 %v808_v0, %v256_v53 }
  0x62   : > { %643 = vmatpush1.bf16.msra.mxu0 %v946_v11 }
  0x63   : > { %644 = vmatprep.subr.bf16.mxu0 %v947_v12  ;;  %v373_v12 = vadd.f32 %v811_v7, %v311_v6 }
  0x66   : > { %645 = vmatpush1.bf16.msra.mxu0 %v949_v14 }
  0x67   : > { %646 = vmatprep.subr.bf16.mxu0 %v950_v15  ;;  %v374_v15 = vadd.f32 %v812_v10, %v312_v9 }
  0x6a   : > { %647 = vmatpush1.bf16.msra.mxu0 %v952_v16 }
  0x6b   : > { %648 = vmatprep.subr.bf16.mxu0 %v953_v17 }
  0x6e   : > { %649 = vmatpush1.bf16.msra.mxu0 %v955_v18 }
  0x6f   : > { %650 = vmatprep.subr.bf16.mxu0 %v956_v19 }
  0x72   : > { %651 = vmatpush1.bf16.msra.mxu0 %v958_v23 }
  0x75   : > { %653 = vmatmul.mubr.bf16.vlgmr.msra.gmra.mrb[0].mxu0 %v426_v24 }
  0xd2   : > { %v202_v25 = vpop.xlane.xlu0 %201 }
  0xd3   : > { %v203_v26 = vmul.f32 0.00390625, %v202_v25 }
  0xd5   : > { %v204_v28 = vadd.f32 1e-05, %v203_v26 }
  0xd7   : > { %959 = vrcp.f32 %v204_v28 }
  0xdc   : > { %v300_v32 = vpop.xlane.xlu0 %299 }
  0xdd   : > { %v251_v29 = vpop.xlane.xlu1 %250  ;;  %v301_v34 = vmul.f32 0.00390625, %v300_v32 }
  0xde   : > { %v252_v40 = vmul.f32 0.00390625, %v251_v29 }
  0xe1   : > { %v960_v35 = vpop.eup %959  ;;  %v364_v36 = vpop.xlane.xlu1 %363 }
  0xe2   : > { %v302_v38 = vmul.f32 %v960_v35, %v301_v34  ;;  %v365_v39 = vmul.f32 0.00390625, %v364_v36  ;;  %v254_v43 = vmul.f32 %v960_v35, %v252_v40 }
  0xe4   : > { %v320_v41 = vrot.slane %v302_v38, %v265_v37  ;;  %v366_v42 = vmul.f32 %v960_v35, %v365_v39  ;;  %v266_v46 = vrot.slane %v254_v43, %v265_v37  ;;  %v274_v55 = vmul.f32 %v254_v43, %v254_v43 }
  0xe5   : > { %v336_v60 = vmul.f32 %v302_v38, %v302_v38  ;;  %v669_v35 = vsub.s32 4, %v1174_v13 }
  0xe6   : > { %v321_v44 = vrot.slane %v320_v41, 7  ;;  %v382_v45 = vrot.slane %v366_v42, %v265_v37  ;;  %v267_v49 = vrot.slane %v266_v46, 1  ;;  %v325_v50 = vmul.f32 %v320_v41, %v1193_v22 }
  0xe7   : > { %v270_v54 = vmul.f32 %v266_v46, %v1185_v20  ;;  %v337_v3 = vadd.f32 %v336_v60, %v274_v55  ;;  %v399_v5 = vmul.f32 %v366_v42, %v366_v42 }
  0xe8   : > { %v324_v47 = vmul.f32 %v321_v44, %v1185_v20  ;;  %v383_v48 = vrot.slane %v382_v45, 6  ;;  %v384_v51 = vrot.slane %v382_v45, 7  ;;  %v271_v58 = vmul.f32 %v267_v49, %v1193_v22 }
  0xe9   : > { %v810_v59 = vrot.slane %v325_v50, 9  ;;  %v400_v11 = vadd.f32 %v399_v5, %v337_v3 }
  0xea   : > { %v809_v56 = vrot.slane %v324_v47, 9  ;;  %v387_v57 = vmul.f32 %v383_v48, %v1185_v20  ;;  %v388_v61 = vmul.f32 %v384_v51, %v1193_v22 }
  0xeb   : > { %v335_v2 = vadd.f32 %v810_v59, %v271_v58  ;;  %v412_v22 = vrot.slane %v400_v11, %v265_v37 }
  0xec   : > { %v334_v62 = vadd.f32 %v809_v56, %v270_v54  ;;  %v813_v1 = vrot.slane %v387_v57, 10  ;;  %v814_v4 = vrot.slane %v388_v61, 10 }
  0xed   : > { %v413_v19 = vrot.slane %v412_v22, 1 }
  0xee   : > { %v397_v8 = vadd.f32 %v813_v1, %v334_v62  ;;  %v398_v20 = vadd.f32 %v814_v4, %v335_v2 }
  0xf0   : > { %v401_v14 = vmul.f32 2.0, %v397_v8  ;;  %v402_v16 = vmul.f32 2.0, %v398_v20 }
  0xf2   : > { %v403_v17 = vsub.f32 %v373_v12, %v401_v14  ;;  %v404_v18 = vsub.f32 %v374_v15, %v402_v16 }
  0xf4   : > { %v416_v23 = vadd.f32 %v412_v22, %v403_v17  ;;  %v417_v24 = vadd.f32 %v413_v19, %v404_v18 }
  0xf6   : > { %v418_v25 = vmul.f32 %v416_v23, %v416_v23  ;;  %v419_v26 = vmul.f32 %v417_v24, %v417_v24 }
  0xf8   : > { %v420_v28 = vsub.f32 0.0, %v418_v25  ;;  %v421_v29 = vsub.f32 0.0, %v419_v26 }
  0xfa   : > { %v422_v30 = vmul.f32 1.442695, %v420_v28  ;;  %v424_v31 = vmul.f32 1.442695, %v421_v29 }
  0xfc   : > { %961 = vpow2.f32 %v422_v30 }
  0xfd   : > { %963 = vpow2.f32 %v424_v31 }
 0x106   : > { %v962_v32 = vpop.eup %961 }
 0x107   : > { %v964_v34 = vpop.eup %963  ;;  %v666_v36 = vrot.slane %v962_v32, %v665_v33  ;;  %v670_v38 = vrot.slane %v962_v32, %v669_v35 }
 0x108   : > { %v674_v37 = vrot.slane %v964_v34, %v665_v33  ;;  %v678_v39 = vrot.slane %v964_v34, %v669_v35 }
 0x10a   : > { %v679_v41 = vsel %vm226_vm1, %v674_v37, %v666_v36  ;;  %v680_v44 = vsel %vm226_vm1, %v678_v39, %v670_v38 }
 0x148   : > { %v654_v40 = vpop.f32.mrb[0].mxu0 }
 0x149   : > { %v683_v42 = vmul.f32 %v679_v41, %v654_v40  ;;  %v656_v43 = vpop.f32.mrb[1].mxu0 }
 0x14a   : > { %v684_v45 = vmul.f32 %v680_v44, %v656_v43  ;;  %v658_v46 = vpop.f32.mrb[2].mxu0 }
 0x14b   : > { %v685_v47 = vmul.f32 %v683_v42, %v1188_v21  ;;  %v659_v48 = vpop.f32.mrb[3].mxu0  ;;  %v699_v49 = vsel %vm197_vm0, %v683_v42, 0.0 }
 0x14c   : > { %v686_v13 = vmul.f32 %v684_v45, %v1201_v27  ;;  %v700_v50 = vsel %vm197_vm0, %v684_v45, 0.0 }
 0x14d   : > { %v701_v51 = vadd.f32 %v700_v50, %v699_v49  ;;  %v687_v52 = vsel %vm197_vm0, %v685_v47, 0.0 }
 0x14e   : > { %v688_v53 = vsel %vm197_vm0, %v686_v13, 0.0 }
 0x14f   : > { %702 = vadd.xlane.f32.xlu1 %v701_v51  ;;  %v689_v54 = vadd.f32 %v688_v53, %v687_v52 }
 0x151   : > { %690 = vadd.xlane.f32.xlu0 %v689_v54 }
 0x1dc   : > { %v703_v55 = vpop.xlane.xlu1 %702 }
 0x1dd   : > { %v704_v56 = vrot.slane %v703_v55, 4 }
 0x1de   : > { %v691_v57 = vpop.xlane.xlu0 %690 }
 0x1df   : > { %v705_v58 = vadd.f32 %v704_v56, %v703_v55  ;;  %v692_v21 = vrot.slane %v691_v57, 4 }
 0x1e1   : > { %v706_v59 = vrot.slane %v705_v58, 2  ;;  %v693_v60 = vadd.f32 %v692_v21, %v691_v57 }
 0x1e3   : > { %v707_v61 = vadd.f32 %v706_v59, %v705_v58  ;;  %v694_v27 = vrot.slane %v693_v60, 2 }
 0x1e5   : > { %v695_v62 = vadd.f32 %v694_v27, %v693_v60  ;;  %v708_v63 = vrot.slane %v707_v61, 1 }
 0x1e7   : > { %v696_v0 = vrot.slane %v695_v62, 1  ;;  %v709_v2 = vadd.f32 %v708_v63, %v707_v61 }
 0x1e9   : > { %v697_v1 = vadd.f32 %v696_v0, %v695_v62 }
 0x1eb   : > { %851 = vpush %v697_v1 }
 0x1ec   : > { %853 = vpush %v709_v2 }
 0x21c   : > { %s852_s4 = spop %851 }
 0x21d   : > { %s854_s5 = spop %853 }
 0x21e   : > { %s711_s6 = sadd.f32 1e-06, %s854_s5 }
 0x220   : > { %v712_v3 = vstv %s711_s6 }
 0x221   : > { %965 = vrcp.f32 %v712_v3 }
 0x22b   : > { %v966_v4 = vpop.eup %965 }
 0x22c   : > { %855 = vpush %v966_v4 }
 0x25d   : > { %s856_s9 = spop %855 }
 0x25e   : > { %s715_s17 = smul.f32 %s856_s9, %s852_s4 }
 0x260   : > { %s716_s25 = sand.u32 2147483647, %s715_s17 }
 0x261   : > { %v717_v5 = vstv %s716_s25 }
 0x262   : > { %718 = vst [vmem:[%s177_s10] sm:$0x1] %v717_v5 }
 0x263   : > { %1008 = shalt.err (!%p1005_p7)
}
 0x264   : > { %s1009_s30 = scalar_lea.hbm %s1258_s24, 16  ;;  %s1013_s6 = scalar_lea.hbm %s1303_s3, 64 }
 0x265   : > { %p1010_p8 = scmp.ne.s32.totalorder %s1258_s24, %s1009_s30  ;;  %p1014_p1 = scmp.lt.u32.totalorder %s1258_s24, %s1303_s3 }
 0x266   : > { %p1015_p0 = scmp.lt.u32.totalorder %s1013_s6, %s1009_s30  ;;  %p1017_p6 = scmp.lt.u32.totalorder %s1009_s30, %s1258_s24 }
 0x267   : > { %p1011_p11 = pnand %p1010_p8, %p1314_p9 }
 0x268   : > { %p1016_p5 = por %p1015_p0, %p1014_p1 }
 0x269   : > { %p1012_p13 = pneg %p1011_p11 }
 0x26a   : > { %p1018_p10 = por %p1017_p6, %p1016_p5 }
 0x26c   : > { %p1019_p12 = pnand %p1018_p10, %p1012_p13 }
 0x26e   : > { %1022 = shalt.err (!%p1019_p12)
}
 0x26f   : > { %861 = dma.vmem_to_hbm [thread:$0]  (%p1314_p9), %s1260_s11, 16, %s1258_s24, %s720_s26  }
 0x270 PF: > { %p873_p2 = scmp.ge.s32.totalorder %s1061_s15, 2  ;;  %s744_s9 = sand.u32 1, %s1049_s12  }
 0x271   : > { %p1315_p3 = scmp.ne.s32.totalorder %s1308_s23, 0  ;;  %s745_s10 = scalar_lea.sflag [#allocation4], %s744_s9 }
 0x273   : > { %p868_p4 = pnand %p873_p2, %p1315_p3 }
 0x275   : > { %1044 = dma.done.wait (!%p868_p4), %s745_s10, 16  }
 0x276   : > { %1046 = vsyncadd (!%p868_p4), %s745_s10, 4294967280  ;;  %p14_p7 = scmp.ge.s32.totalorder %s1114_s18, 6   ;;  %s1316_s12 = smov %s1053_s13 }
 0x277   : > { %s1317_s13 = smov %s1057_s14  ;;  %s1318_s14 = smov %s1125_s21 }
 0x278   : > { %s1319_s15 = smov %s1114_s18  ;;  %16 = sbr.rel (!%p14_p7) target bundleno = 4 (0x4), region = 72 }
 0x27f   :  { %749 = vsyncpa [#allocation3], 1 }
 0x280   :  { %751 = vsyncpa [#allocation3 + $0x1], 1 }
 0x281   :  { %752 = vsyncpa [#allocation4], 1 }
 0x282   :  { %754 = vsyncpa [#allocation4 + $0x1], 1 }

</bundles_post_ra>
